<compile_context>
chip_gen: v7x
topology: tpu7x:2x2x1
jax: 0.10.0
libtpu: 0.0.40
codegen_flags: <defaults>
</compile_context>

<pallas_src>
import jax
import jax.numpy as jnp
from jax.experimental import pallas as pl
from jax.experimental.pallas import tpu as pltpu

EMBED_DIM = 768   # hard-coded in the module
PROJ_DIM = 128    # nn.Linear(768, 128)


def clip_embed_kernel(patches_ref, wf_ref, pos_ref, out_ref):
    # patches_ref: (TILE_M, Kp)  bf16 -- flattened patch rows (c, kh, kw order)
    # wf_ref     : (Kp, 128)     bf16 -- fused (patch-conv @ proj) weight
    # pos_ref    : (TILE_M, 128) f32  -- projected position embedding per row (+ bias)
    # out_ref    : (TILE_M, 128) f32
    acc = jnp.dot(patches_ref[...], wf_ref[...],
                  preferred_element_type=jnp.float32)
    out_ref[...] = (acc + pos_ref[...]).astype(out_ref.dtype)


def _round_up(x, m):
    return ((x + m - 1) // m) * m


def clip_vision_embeddings(pixel_values, params, patch_size, *,
                           tile_m=256, compute_dtype=jnp.bfloat16):
    """Matches CLIPVisionEmbeddings.forward: (B, 3, H, W) -> (B, np+1, 128)."""
    B, C, H, W = pixel_values.shape
    P = patch_size
    gh, gw = H // P, W // P
    num_patches = gh * gw
    K = C * P * P

    # --- plain-JAX glue: patchify (NCHW -> (B*np, C*P*P), (c, kh, kw) order,
    #     the same order nn.Conv2d flattens its (O, I, kh, kw) weight). ---
    x = pixel_values.reshape(B, C, gh, P, gw, P)
    x = x.transpose(0, 2, 4, 1, 3, 5)                       # (B, gh, gw, C, P, P)
    patches = x.reshape(B * num_patches, K)

    # --- algebraic fusion of the two matmuls (one-time, amortized over calls) ---
    wp_t = params["patch_weight"].reshape(EMBED_DIM, K).T.astype(jnp.float32)  # (K, 768)
    wproj_t = params["proj_weight"].T.astype(jnp.float32)                      # (768, 128)
    w_fused = wp_t @ wproj_t                                                   # (K, 128)
    pos_proj = (params["position_embedding"] @ wproj_t
                + params["proj_bias"][None, :])                                # (np+1, 128)
    # Batch-invariant class-token output row, computed once outside the kernel.
    cls_row = ((params["class_embedding"] + params["position_embedding"][0])
               @ wproj_t + params["proj_bias"])                                # (128,)

    # --- pad K to a multiple of 128 so every MXU push is full-width ---
    Kp = _round_up(K, 128)
    if Kp != K:
        patches = jnp.pad(patches, ((0, 0), (0, Kp - K)))
        w_fused = jnp.pad(w_fused, ((0, Kp - K), (0, 0)))

    # Per-row projected position term (patch rows only), replicated across batch.
    pos_rows = jnp.tile(pos_proj[1:], (B, 1))                                  # (B*np, 128)

    # --- row tiling: pad B*np up to a multiple of TILE_M (TILE_M multiple of 8) ---
    M = B * num_patches
    tm = tile_m if M >= tile_m else max(8, _round_up(M, 8))
    Mp = _round_up(M, tm)
    if Mp != M:
        patches = jnp.pad(patches, ((0, Mp - M), (0, 0)))
        pos_rows = jnp.pad(pos_rows, ((0, Mp - M), (0, 0)))

    patches_c = patches.astype(compute_dtype)
    w_fused_c = w_fused.astype(compute_dtype)
    pos_rows = pos_rows.astype(jnp.float32)

    out_flat = pl.pallas_call(
        clip_embed_kernel,
        out_shape=jax.ShapeDtypeStruct((Mp, PROJ_DIM), jnp.float32),
        grid_spec=pltpu.PrefetchScalarGridSpec(
            num_scalar_prefetch=0,
            grid=(Mp // tm,),
            in_specs=[
                pl.BlockSpec((tm, Kp), lambda m: (m, 0)),
                # Fused weight / pos term are grid-invariant (constant index_map);
                # small enough post-fusion that default buffering is fine.
                pl.BlockSpec((Kp, PROJ_DIM), lambda m: (0, 0)),
                pl.BlockSpec((tm, PROJ_DIM), lambda m: (m, 0)),
            ],
            out_specs=pl.BlockSpec((tm, PROJ_DIM), lambda m: (m, 0)),
        ),
        compiler_params=pltpu.CompilerParams(
            dimension_semantics=("parallel",)),
    )(patches_c, w_fused_c, pos_rows)

    patch_out = out_flat[:M].reshape(B, num_patches, PROJ_DIM)
    cls_out = jnp.broadcast_to(cls_row.astype(jnp.float32)[None, None, :],
                               (B, 1, PROJ_DIM))
    return jnp.concatenate([cls_out, patch_out], axis=1)


def reference_forward(pixel_values, params, patch_size):
    """Pure-JAX reference that mirrors the PyTorch forward exactly."""
    patch_embeds = jax.lax.conv_general_dilated(
        pixel_values, params["patch_weight"],
        window_strides=(patch_size, patch_size), padding="VALID",
        dimension_numbers=("NCHW", "OIHW", "NCHW"))                  # (B, 768, gh, gw)
    B, D, gh, gw = patch_embeds.shape
    patch_embeds = patch_embeds.reshape(B, D, gh * gw).transpose(0, 2, 1)
    class_embeds = jnp.broadcast_to(params["class_embedding"], (B, 1, D))
    emb = jnp.concatenate([class_embeds, patch_embeds], axis=1)
    emb = emb + params["position_embedding"][None]
    emb = emb @ params["proj_weight"].T + params["proj_bias"]
    return emb


def init_params(key, patch_size, num_positions):
    k1, k2, k3, k4, k5 = jax.random.split(key, 5)
    scale = 0.02
    return {
        # nn.Conv2d(3, 768, kernel_size=P, stride=P, bias=False) weight: (768, 3, P, P)
        "patch_weight": scale * jax.random.normal(
            k1, (EMBED_DIM, 3, patch_size, patch_size), jnp.float32),
        # nn.Parameter(torch.randn(768))
        "class_embedding": jax.random.normal(k2, (EMBED_DIM,), jnp.float32),
        # nn.Embedding(num_positions, 768) weight
        "position_embedding": scale * jax.random.normal(
            k3, (num_positions, EMBED_DIM), jnp.float32),
        # nn.Linear(768, 128)
        "proj_weight": scale * jax.random.normal(k4, (PROJ_DIM, EMBED_DIM), jnp.float32),
        "proj_bias": scale * jax.random.normal(k5, (PROJ_DIM,), jnp.float32),
    }


if __name__ == "__main__":
    # Small but consistent config: image_size=32, patch_size=16 -> 4 patches, 5 positions.
    batch_size, image_size, patch_size = 2, 32, 16
    num_patches = (image_size // patch_size) ** 2
    num_positions = num_patches + 1

    key = jax.random.PRNGKey(0)
    k_params, k_pix = jax.random.split(key)
    params = init_params(k_params, patch_size, num_positions)
    pixel_values = jax.random.normal(
        k_pix, (batch_size, 3, image_size, image_size), jnp.float32)

    out = clip_vision_embeddings(pixel_values, params, patch_size)
    out = jax.block_until_ready(out)

    ref = reference_forward(pixel_values, params, patch_size)
    ref = jax.block_until_ready(ref)

    assert out.shape == (batch_size, num_positions, PROJ_DIM), out.shape
    assert jnp.allclose(out, ref, rtol=2e-2, atol=2e-2), float(
        jnp.max(jnp.abs(out - ref)))

    print("KERNEL_OK")
</pallas_src>

<mosaic_0001>
module attributes {stable_mosaic.version = 11 : i64} {
  func.func @clip_embed_kernel(%arg0: i32, %arg1: memref<8x768xbf16, #tpu.memory_space<vmem>>, %arg2: memref<768x128xbf16, #tpu.memory_space<vmem>>, %arg3: memref<8x128xf32, #tpu.memory_space<vmem>>, %arg4: memref<8x128xf32, #tpu.memory_space<vmem>>) attributes {dimension_semantics = [#tpu.dimension_semantics<parallel>], iteration_bounds = array<i64: 1>, scalar_prefetch = 0 : i64, scratch_operands = 0 : i64, tpu.core_type = #tpu.core_type<tc>, window_params = [{transform_indices = @transform_0, window_bounds = array<i64: 8, 768>}, {pipeline_mode = #tpu.pipeline_mode<synchronous>, transform_indices = @transform_1, window_bounds = array<i64: 768, 128>}, {transform_indices = @transform_2, window_bounds = array<i64: 8, 128>}, {transform_indices = @transform_3, window_bounds = array<i64: 8, 128>}]} {
    %c0 = arith.constant 0 : index
    %c0_0 = arith.constant 0 : index
    %0 = vector.load %arg1[%c0, %c0_0] : memref<8x768xbf16, #tpu.memory_space<vmem>>, vector<8x768xbf16>
    %c0_1 = arith.constant 0 : index
    %c0_2 = arith.constant 0 : index
    %1 = vector.load %arg2[%c0_1, %c0_2] : memref<768x128xbf16, #tpu.memory_space<vmem>>, vector<768x128xbf16>
    %cst = arith.constant dense<0.000000e+00> : vector<8x128xf32>
    %2 = tpu.matmul %0, %1, %cst {dimension_numbers = #tpu.dot_dimension_numbers<[1], [0], [0], [1], [0, 0, 1, 1], [], []>} : vector<8x768xbf16>, vector<768x128xbf16>, vector<8x128xf32> -> vector<8x128xf32>
    %c0_3 = arith.constant 0 : index
    %c0_4 = arith.constant 0 : index
    %3 = vector.load %arg3[%c0_3, %c0_4] : memref<8x128xf32, #tpu.memory_space<vmem>>, vector<8x128xf32>
    %4 = arith.addf %2, %3 : vector<8x128xf32>
    %c0_5 = arith.constant 0 : index
    %c0_6 = arith.constant 0 : index
    %5 = vector.load %arg4[%c0_5, %c0_6] : memref<8x128xf32, #tpu.memory_space<vmem>>, vector<8x128xf32>
    tpu.vector_store %arg4[%c0_5, %c0_6], %4 {strides = array<i32>} : memref<8x128xf32, #tpu.memory_space<vmem>>, vector<8x128xf32>,
    return
  }
  func.func @transform_0(%arg0: i32) -> (i32, i32) {
    %c0_i32 = arith.constant 0 : i32
    %c0_i32_0 = arith.constant 0 : i32
    return %arg0, %c0_i32 : i32, i32
  }
  func.func @transform_1(%arg0: i32) -> (i32, i32) {
    %c0_i32 = arith.constant 0 : i32
    %c0_i32_0 = arith.constant 0 : i32
    %c0_i32_1 = arith.constant 0 : i32
    return %c0_i32, %c0_i32_0 : i32, i32
  }
  func.func @transform_2(%arg0: i32) -> (i32, i32) {
    %c0_i32 = arith.constant 0 : i32
    %c0_i32_0 = arith.constant 0 : i32
    return %arg0, %c0_i32 : i32, i32
  }
  func.func @transform_3(%arg0: i32) -> (i32, i32) {
    %c0_i32 = arith.constant 0 : i32
    %c0_i32_0 = arith.constant 0 : i32
    return %arg0, %c0_i32 : i32, i32
  }
}

</mosaic_0001>

<bundles_post_ra>
// kernel: tpu_custom_call.1
= control target key start
LH: loop header
LB: loop body
LE: loop exit
PB: predicated region body
PF: predicated region fallthrough
CT: control target
= control target key end

     0   :  { %8 = vsyncpa [#allocation3], 0  ;;  %s947_s0 = inlined_call_operand.hbm [shape: bf16[8,768], index: 0, kind: input, shape index: {}]   ;;  %s948_s1 = inlined_call_operand.hbm [shape: bf16[768,128], index: 1, kind: input, shape index: {}]   ;;  %s949_s2 = inlined_call_operand.hbm [shape: f32[8,128], index: 2, kind: input, shape index: {}]   ;;  %s950_s3 = inlined_call_operand.hbm [shape: f32[8,128], index: 3, kind: output, shape index: {}]  }
   0x1   :  { %9 = vsyncpa [#allocation6], 0 }
   0x2   :  { %10 = vsyncpa [#allocation4], 0  ;;  %s873_s12 = smov [#allocation5]   ;;  %s779_s16 = scalar_lea.hbm %s948_s1, 6144 }
   0x3   :  { %s26_s13 = sshll.u32 %s873_s12, 4  ;;  %p780_p0 = scmp.ne.s32.totalorder %s948_s1, %s779_s16  ;;  %s27_s13 = int_to_ptr.vmem [resolvable:$true] %s26_s13 }
   0x4   :  { %p783_p1 = scmp.lt.u32.totalorder %s779_s16, %s948_s1 }
   0x6   :  { %p785_p2 = pnand %p783_p1, %p780_p0 }
   0x8   :  { %788 = shalt.err (!%p785_p2)
}
   0x9   :  { %s789_s21 = scalar_lea.vmem %s27_s13, 6144  ;;  %p794_p4 = scmp.lt.s32.totalorder %s27_s13, %s27_s13 }
   0xa   :  { %p790_p3 = scmp.ne.s32.totalorder %s27_s13, %s789_s21  ;;  %p795_p5 = scmp.lt.s32.totalorder %s789_s21, %s789_s21 }
   0xc   :  { %p796_p6 = por %p795_p5, %p794_p4 }
   0xe   :  { %p797_p7 = pnand %p796_p6, %p790_p3 }
  0x10   :  { %800 = shalt.err (!%p797_p7)
}
  0x11   :  { %s874_s22 = smov 64   ;;  %s875_s23 = smov 4  }
  0x12   :  { %32 = dma.hbm_to_vmem [thread:$0]  %s948_s1, 6144, %s27_s13, [#allocation6], %s874_s22, %s874_s22, %s875_s23  }
  0x13   :  { %s876_s26 = smov [#allocation2]   ;;  %s877_s28 = smov [#allocation7]  }
  0x14   :  { %s17_s27 = sshll.u32 %s876_s26, 4  ;;  %s39_s29 = sshll.u32 %s877_s28, 4  ;;  %s18_s27 = int_to_ptr.vmem [resolvable:$true] %s17_s27  ;;  %s40_s29 = int_to_ptr.vmem [resolvable:$true] %s39_s29 }
  0x15   :  { %s801_s5 = scalar_lea.hbm %s947_s0, 384 }
  0x16   :  { %p802_p8 = scmp.ne.s32.totalorder %s947_s0, %s801_s5  ;;  %p805_p9 = scmp.lt.u32.totalorder %s801_s5, %s947_s0 }
  0x18   :  { %p807_p10 = pnand %p805_p9, %p802_p8 }
  0x1a   :  { %810 = shalt.err (!%p807_p10)
}
  0x1b   :  { %s811_s1 = scalar_lea.vmem %s18_s27, 384  ;;  %p816_p12 = scmp.lt.s32.totalorder %s18_s27, %s18_s27 }
  0x1c   :  { %p812_p11 = scmp.ne.s32.totalorder %s18_s27, %s811_s1  ;;  %p817_p13 = scmp.lt.s32.totalorder %s811_s1, %s811_s1 }
  0x1e   :  { %p818_p0 = por %p817_p13, %p816_p12 }
  0x20   :  { %p819_p1 = pnand %p818_p0, %p812_p11 }
  0x22   :  { %822 = shalt.err (!%p819_p1)
}
  0x23   :  { %20 = dma.hbm_to_vmem [thread:$0]  %s947_s0, 384, %s18_s27, [#allocation3]  }
  0x24   :  { %s823_s14 = scalar_lea.hbm %s949_s2, 128 }
  0x25   :  { %p824_p2 = scmp.ne.s32.totalorder %s949_s2, %s823_s14  ;;  %p827_p3 = scmp.lt.u32.totalorder %s823_s14, %s949_s2 }
  0x27   :  { %p829_p4 = pnand %p827_p3, %p824_p2 }
  0x29   :  { %832 = shalt.err (!%p829_p4)
}
  0x2a   :  { %s833_s19 = scalar_lea.vmem %s40_s29, 128  ;;  %p838_p6 = scmp.lt.s32.totalorder %s40_s29, %s40_s29 }
  0x2b   :  { %p834_p5 = scmp.ne.s32.totalorder %s40_s29, %s833_s19  ;;  %p839_p7 = scmp.lt.s32.totalorder %s833_s19, %s833_s19 }
  0x2d   :  { %p840_p8 = por %p839_p7, %p838_p6 }
  0x2f   :  { %p841_p9 = pnand %p840_p8, %p834_p5 }
  0x31   :  { %844 = shalt.err (!%p841_p9)
}
  0x32   :  { %42 = dma.hbm_to_vmem [thread:$0]  %s949_s2, 128, %s40_s29, [#allocation6]  }
  0x33   :  { %867 = dma.done.wait [#allocation3], 384  }
  0x34   :  { %868 = vsyncadd [#allocation3], 4294966912 }
  0x35   :  { %869 = dma.done.wait [#allocation6], 6272  }
  0x36   :  { %870 = vsyncadd [#allocation6], 4294961024  ;;  %v725_v0 = vld [vmem:[#allocation5 + $0x40] sm:$0xff]   ;;  %v729_v4 = vld [vmem:[#allocation5 + $0x48] sm:$0xff]   ;;  %s878_s2 = smov [#allocation8]  }
  0x37   :  { %v726_v1 = vld [vmem:[#allocation5] sm:$0xff]   ;;  %653 = vmatprep.subr.bf16.mxu0 %v725_v0  ;;  %v730_v5 = vld [vmem:[#allocation5 + $0x8] sm:$0xff]   ;;  %v733_v8 = vld [vmem:[#allocation5 + $0x50] sm:$0xff]   ;;  %s589_s21 = sshll.u32 %s878_s2, 4  ;;  %s590_s21 = int_to_ptr.vmem [resolvable:$true] %s589_s21 }
  0x38   :  { %v727_v2 = vld [vmem:[#allocation5 + $0xc0] sm:$0xff]   ;;  %654 = vmatpush3.bf16.msra.mxu0 %v726_v1  ;;  %v731_v6 = vld [vmem:[#allocation5 + $0xc8] sm:$0xff]   ;;  %v734_v9 = vld [vmem:[#allocation5 + $0x10] sm:$0xff]   ;;  %s845_s22 = scalar_lea.vmem %s590_s21, 128  ;;  %p850_p11 = scmp.lt.s32.totalorder %s590_s21, %s590_s21 }
  0x39   :  { %v728_v3 = vld [vmem:[#allocation5 + $0x80] sm:$0xff]   ;;  %675 = vmatprep.subr.bf16.mxu1 %v727_v2  ;;  %655 = vmatprep.subr.bf16.mxu0 %v729_v4  ;;  %v732_v7 = vld [vmem:[#allocation5 + $0x88] sm:$0xff]   ;;  %v735_v10 = vld [vmem:[#allocation5 + $0xd0] sm:$0xff]   ;;  %p846_p10 = scmp.ne.s32.totalorder %s590_s21, %s845_s22  ;;  %p851_p12 = scmp.lt.s32.totalorder %s845_s22, %s845_s22 }
  0x3a   :  { %676 = vmatpush3.bf16.msra.mxu1 %v728_v3  ;;  %v736_v11 = vld [vmem:[#allocation5 + $0x90] sm:$0xff]   ;;  %v737_v12 = vld [vmem:[#allocation5 + $0x58] sm:$0xff]   ;;  %v741_v16 = vld [vmem:[#allocation5 + $0x60] sm:$0xff]  }
  0x3b   :  { %677 = vmatprep.subr.bf16.mxu1 %v731_v6  ;;  %v738_v13 = vld [vmem:[#allocation5 + $0x18] sm:$0xff]   ;;  %v742_v17 = vld [vmem:[#allocation5 + $0x20] sm:$0xff]   ;;  %v745_v20 = vld [vmem:[#allocation5 + $0x68] sm:$0xff]   ;;  %p852_p13 = por %p851_p12, %p850_p11 }
  0x3c   :  { %656 = vmatpush3.bf16.msra.mxu0 %v730_v5  ;;  %v739_v14 = vld [vmem:[#allocation5 + $0xd8] sm:$0xff]   ;;  %v743_v18 = vld [vmem:[#allocation5 + $0xe0] sm:$0xff]   ;;  %v746_v21 = vld [vmem:[#allocation5 + $0x28] sm:$0xff]  }
  0x3d   :  { %657 = vmatprep.subr.bf16.mxu0 %v733_v8  ;;  %v740_v15 = vld [vmem:[#allocation5 + $0x98] sm:$0xff]   ;;  %v744_v19 = vld [vmem:[#allocation5 + $0xa0] sm:$0xff]   ;;  %v747_v22 = vld [vmem:[#allocation5 + $0xe8] sm:$0xff]   ;;  %p853_p0 = pnand %p852_p13, %p846_p10 }
  0x3e   :  { %678 = vmatpush3.bf16.msra.mxu1 %v732_v7  ;;  %v748_v23 = vld [vmem:[#allocation5 + $0xa8] sm:$0xff]   ;;  %v749_v24 = vld [vmem:[#allocation5 + $0x70] sm:$0xff]   ;;  %v753_v28 = vld [vmem:[#allocation5 + $0x78] sm:$0xff]  }
  0x3f   :  { %679 = vmatprep.subr.bf16.mxu1 %v735_v10  ;;  %v750_v25 = vld [vmem:[#allocation5 + $0x30] sm:$0xff]   ;;  %v754_v29 = vld [vmem:[#allocation5 + $0x38] sm:$0xff]   ;;  %v53_v31 = vld [vmem:[#allocation2] sm:$0xff] }
  0x40   :  { %658 = vmatpush3.bf16.msra.mxu0 %v734_v9  ;;  %v751_v26 = vld [vmem:[#allocation5 + $0xf0] sm:$0xff]   ;;  %v755_v30 = vld [vmem:[#allocation5 + $0xf8] sm:$0xff]   ;;  %v599_v32 = vcombine.low %v53_v31, %v53_v31  ;;  %v600_v33 = vcombine.high %v53_v31, %v53_v31  ;;  %v759_v35 = vld [vmem:[#allocation5 + $0x140] sm:$0xff]  }
  0x41   :  { %659 = vmatprep.subr.bf16.mxu0 %v737_v12  ;;  %v752_v27 = vld [vmem:[#allocation5 + $0xb0] sm:$0xff]   ;;  %v758_v34 = vld [vmem:[#allocation5 + $0xb8] sm:$0xff]   ;;  %v762_v39 = vld [vmem:[#allocation5 + $0x100] sm:$0xff]  }
  0x42   :  { %680 = vmatpush3.bf16.msra.mxu1 %v736_v11  ;;  %v54_v36 = vld [vmem:[#allocation2 + $0x8] sm:$0xff]  ;;  %494 = vmatprep.mubr.bf16.mxu0 %v600_v33  ;;  %v763_v40 = vld [vmem:[#allocation5 + $0x148] sm:$0xff]   ;;  %v767_v44 = vld [vmem:[#allocation5 + $0x158] sm:$0xff]  }
  0x43   :  { %681 = vmatprep.subr.bf16.mxu1 %v739_v14  ;;  %v601_v37 = vcombine.low %v54_v36, %v54_v36  ;;  %v602_v38 = vcombine.high %v54_v36, %v54_v36  ;;  %v764_v41 = vld [vmem:[#allocation5 + $0x108] sm:$0xff]   ;;  %v765_v42 = vld [vmem:[#allocation5 + $0x150] sm:$0xff]   ;;  %v768_v45 = vld [vmem:[#allocation5 + $0x118] sm:$0xff]  }
  0x44   :  { %660 = vmatpush3.bf16.msra.mxu0 %v738_v13  ;;  %v766_v43 = vld [vmem:[#allocation5 + $0x110] sm:$0xff]   ;;  %v769_v46 = vld [vmem:[#allocation5 + $0x160] sm:$0xff]   ;;  %v55_v48 = vld [vmem:[#allocation2 + $0x10] sm:$0xff] }
  0x45   :  { %661 = vmatprep.subr.bf16.mxu0 %v741_v16  ;;  %534 = vmatprep.mubr.bf16.mxu1 %v602_v38  ;;  %v770_v47 = vld [vmem:[#allocation5 + $0x120] sm:$0xff]   ;;  %v771_v49 = vld [vmem:[#allocation5 + $0x168] sm:$0xff]   ;;  %v604_v50 = vcombine.high %v55_v48, %v55_v48  ;;  %v773_v52 = vld [vmem:[#allocation5 + $0x170] sm:$0xff]   ;;  %v603_v56 = vcombine.low %v55_v48, %v55_v48 }
  0x46   :  { %682 = vmatpush3.bf16.msra.mxu1 %v740_v15  ;;  %v772_v51 = vld [vmem:[#allocation5 + $0x128] sm:$0xff]   ;;  %v774_v53 = vld [vmem:[#allocation5 + $0x130] sm:$0xff]   ;;  %v775_v54 = vld [vmem:[#allocation5 + $0x178] sm:$0xff]  }
  0x47   :  { %683 = vmatprep.subr.bf16.mxu1 %v743_v18  ;;  %v776_v55 = vld [vmem:[#allocation5 + $0x138] sm:$0xff]   ;;  %v152_v58 = vld [vmem:[#allocation7] sm:$0xff] }
  0x48   :  { %662 = vmatpush3.bf16.msra.mxu0 %v742_v17 }
  0x49   :  { %663 = vmatprep.subr.bf16.mxu0 %v745_v20 }
  0x4a   :  { %684 = vmatpush3.bf16.msra.mxu1 %v744_v19 }
  0x4b   :  { %685 = vmatprep.subr.bf16.mxu1 %v747_v22 }
  0x4c   :  { %664 = vmatpush3.bf16.msra.mxu0 %v746_v21 }
  0x4d   :  { %665 = vmatprep.subr.bf16.mxu0 %v749_v24 }
  0x4e   :  { %686 = vmatpush3.bf16.msra.mxu1 %v748_v23 }
  0x4f   :  { %687 = vmatprep.subr.bf16.mxu1 %v751_v26 }
  0x50   :  { %666 = vmatpush3.bf16.msra.mxu0 %v750_v25 }
  0x51   :  { %667 = vmatprep.subr.bf16.mxu0 %v753_v28 }
  0x52   :  { %688 = vmatpush3.bf16.msra.mxu1 %v752_v27 }
  0x53   :  { %689 = vmatprep.subr.bf16.mxu1 %v755_v30 }
  0x54   :  { %668 = vmatpush3.bf16.msra.mxu0 %v754_v29 }
  0x55   :  { %697 = vmatprep.subr.bf16.mxu0 %v759_v35 }
  0x56   :  { %690 = vmatpush3.bf16.msra.mxu1 %v758_v34 }
  0x57   :  { %495 = vmatmul.mubr.bf16.vlgmr.msra.gmra.mrb[0].mxu0 %v599_v32 }
  0x58   :  { %698 = vmatpush3.bf16.msra.mxu0 %v762_v39  ;;  %574 = vmatprep.mubr.bf16.mxu0 %v604_v50 }
  0x59   :  { %535 = vmatmul.mubr.bf16.vlgmr.msra.gmra.mrb[0].mxu1 %v601_v37  ;;  %699 = vmatprep.subr.bf16.mxu0 %v763_v40 }
  0x5c   :  { %700 = vmatpush3.bf16.msra.mxu0 %v764_v41 }
  0x5d   :  { %701 = vmatprep.subr.bf16.mxu0 %v765_v42 }
  0x60   :  { %702 = vmatpush3.bf16.msra.mxu0 %v766_v43 }
  0x61   :  { %703 = vmatprep.subr.bf16.mxu0 %v767_v44 }
  0x64   :  { %704 = vmatpush3.bf16.msra.mxu0 %v768_v45 }
  0x65   :  { %705 = vmatprep.subr.bf16.mxu0 %v769_v46 }
  0x68   :  { %706 = vmatpush3.bf16.msra.mxu0 %v770_v47 }
  0x69   :  { %707 = vmatprep.subr.bf16.mxu0 %v771_v49 }
  0x6c   :  { %708 = vmatpush3.bf16.msra.mxu0 %v772_v51 }
  0x6d   :  { %709 = vmatprep.subr.bf16.mxu0 %v773_v52 }
  0x70   :  { %710 = vmatpush3.bf16.msra.mxu0 %v774_v53 }
  0x71   :  { %711 = vmatprep.subr.bf16.mxu0 %v775_v54 }
  0x74   :  { %712 = vmatpush3.bf16.msra.mxu0 %v776_v55 }
  0x77   :  { %575 = vmatmul.mubr.bf16.vlgmr.msra.gmra.mrb[4].mxu0 %v603_v56 }
 0x12a   :  { %v669_v57 = vpop.f32.mrb[0].mxu0 }
 0x12b   :  { %v670_v59 = vpop.f32.mrb[1].mxu0 }
 0x12c   :  { %v671_v60 = vadd.f32 %v670_v59, %v669_v57  ;;  %v672_v61 = vpop.f32.mrb[2].mxu0  ;;  %v691_v62 = vpop.f32.mrb[0].mxu1 }
 0x12d   :  { %v673_v63 = vpop.f32.mrb[3].mxu0  ;;  %v692_v0 = vpop.f32.mrb[1].mxu1 }
 0x12e   :  { %v497_v1 = vadd.f32 %v671_v60, %v152_v58  ;;  %v693_v2 = vadd.f32 %v692_v0, %v691_v62  ;;  %v694_v3 = vpop.f32.mrb[2].mxu1 }
 0x12f   :  { %v695_v4 = vpop.f32.mrb[3].mxu1 }
 0x130   :  { %v537_v5 = vadd.f32 %v693_v2, %v497_v1 }
 0x14a   :  { %v713_v6 = vpop.f32.mrb[4].mxu0 }
 0x14b   :  { %v714_v7 = vpop.f32.mrb[5].mxu0 }
 0x14c   :  { %v715_v8 = vadd.f32 %v714_v7, %v713_v6  ;;  %v716_v9 = vpop.f32.mrb[6].mxu0 }
 0x14d   :  { %v717_v10 = vpop.f32.mrb[7].mxu0 }
 0x14e   :  { %v577_v11 = vadd.f32 %v715_v8, %v537_v5 }
 0x150   :  { %582 = vst [vmem:[#allocation8] sm:$0xff] %v577_v11 }
 0x151   :  { %856 = shalt.err (!%p853_p0)
}
 0x152   :  { %s857_s25 = scalar_lea.hbm %s950_s3, 128 }
 0x153   :  { %p858_p1 = scmp.ne.s32.totalorder %s950_s3, %s857_s25  ;;  %p861_p2 = scmp.lt.u32.totalorder %s857_s25, %s950_s3 }
 0x155   :  { %p863_p3 = pnand %p861_p2, %p858_p1 }
 0x157   :  { %866 = shalt.err (!%p863_p3)
}
 0x158   :  { %592 = dma.vmem_to_hbm [thread:$0]  %s590_s21, 128, %s950_s3, [#allocation4]  }
 0x159   :  { %871 = dma.done.wait [#allocation4], 128  }
 0x15a   :  { %872 = vsyncadd [#allocation4], 4294967168 }
 0x15b   :  { %596 = vsyncpa [#allocation3], 1 }
 0x15c   :  { %597 = vsyncpa [#allocation6], 1 }
 0x15d   :  { %598 = vsyncpa [#allocation4], 1 }

</bundles_post_ra>
